<compile_context>
chip_gen: v6e
topology: v6e:2x2x1
jax: 0.10.0
libtpu: 0.0.40
codegen_flags: <defaults>
</compile_context>

<pallas_src>
import jax
import jax.numpy as jnp
from jax.experimental import pallas as pl
from jax.experimental.pallas import tpu as pltpu

SMOOTH = 1e-07
EPS = 1e-07

LANES = 128
CHUNK_ROWS = 256                     # in-kernel sub-chunk (bounds VMEM temporaries)
VMEM_LIMIT_BYTES = 32 * 1024 * 1024  # explicit scoped-VMEM limit (fits all gens)


def _tensorcores_per_chip():
    """Best-effort: 2 for multi-TensorCore chips (v7x / megacore v4, v5p), else 1."""
    try:
        kind = jax.devices()[0].device_kind.lower()
    except Exception:
        return 1
    if "v7" in kind or "v4" in kind or "v5p" in kind:
        return 2
    return 1


def _make_dice_kernel(rows_valid, block_rows, blocks_per_core, chunk_rows,
                      n_chunks, apply_sigmoid):
    """Builds the reduction kernel; all geometry is static (baked in)."""

    def kernel(yp_ref, yt_ref, out_ref):
        c = pl.program_id(0)   # core split ("parallel"; sharded on multi-TC chips)
        i = pl.program_id(1)   # row-block within this core ("arbitrary")

        # Zero this core's resident accumulator tiles at the start of its pass.
        @pl.when(i == 0)
        def _():
            out_ref[...] = jnp.zeros_like(out_ref)

        g = c * blocks_per_core + i        # global (unclamped) block index
        start_row = g * block_rows         # global row offset of this block
        end_row = start_row + block_rows

        def accum_chunk(r0, masked):
            x = yp_ref[pl.ds(r0, chunk_rows), :].astype(jnp.float32)
            t = yt_ref[pl.ds(r0, chunk_rows), :].astype(jnp.float32)
            # sigmoid affine (0.5*h + 0.5) is hoisted to the wrapper; only the
            # EUP tanh runs per element in-kernel.
            h = jnp.tanh(0.5 * x) if apply_sigmoid else x
            if masked:
                lrow = jax.lax.broadcasted_iota(jnp.int32, (chunk_rows, LANES), 0)
                valid = (start_row + r0 + lrow) < rows_valid
                zero = jnp.float32(0.0)
                h = jnp.where(valid, h, zero)
                t = jnp.where(valid, t, zero)

            def fold(v):  # (chunk_rows,128) -> (8,128): cross-vreg VALU adds only
                return jnp.sum(v.reshape(-1, 8, LANES), axis=0)

            out_ref[0, 0] += fold(h * t)   # sum(h * t)
            out_ref[0, 1] += fold(h)       # sum(h)
            out_ref[0, 2] += fold(t)       # sum(t)

        def process(masked):
            if n_chunks == 1:
                accum_chunk(0, masked)
            else:
                def body(j, carry):
                    r0 = pl.multiple_of(j * chunk_rows, chunk_rows)
                    accum_chunk(r0, masked)
                    return carry
                jax.lax.fori_loop(0, n_chunks, body, 0)

        # Fast path: block fully inside the valid rows -> no masking.
        @pl.when(end_row <= rows_valid)
        def _():
            process(masked=False)

        # Partial last block: mask by global row index (covers Pallas' padded
        # undefined rows of the last block).
        @pl.when((start_row < rows_valid) & (end_row > rows_valid))
        def _():
            process(masked=True)

        # start_row >= rows_valid (clamped duplicate block): skip all compute.

    return kernel


def _dice_partial_sums(yp2, yt2, apply_sigmoid):
    """Returns (sum(h*t), sum(h), sum(t)) over the (rows,128) view."""
    rows = yp2.shape[0]
    cores = _tensorcores_per_chip()
    max_block_rows = 8192 if cores >= 2 else 4096   # 4 MiB vs 2 MiB f32 / input / buf

    rows8 = ((rows + 7) // 8) * 8
    if rows8 <= CHUNK_ROWS:
        block_rows = rows8
    else:
        # Keep block_rows a multiple of CHUNK_ROWS so the in-kernel chunk loop
        # divides exactly.
        block_rows = min(max_block_rows,
                         ((rows8 + CHUNK_ROWS - 1) // CHUNK_ROWS) * CHUNK_ROWS)
    chunk_rows = min(CHUNK_ROWS, block_rows)
    n_chunks = block_rows // chunk_rows

    total_blocks = pl.cdiv(rows, block_rows)
    # Only split across cores on multi-TC chips; on v5e/v6e the split is just
    # extra sequential grid steps (and a wasted duplicate DMA when odd).
    num_splits = 2 if (cores >= 2 and total_blocks >= 2) else 1
    blocks_per_core = pl.cdiv(total_blocks, num_splits)

    def in_index_map(c, i):
        g = c * blocks_per_core + i
        # Clamp so the DMA never addresses past the array; the clamped
        # (duplicate) block is skipped entirely in-kernel.
        return (jnp.minimum(g, total_blocks - 1), 0)

    in_spec = pl.BlockSpec((block_rows, LANES), in_index_map)
    out_spec = pl.BlockSpec((1, 3, 8, LANES), lambda c, i: (c, 0, 0, 0))

    kernel = _make_dice_kernel(rows, block_rows, blocks_per_core, chunk_rows,
                               n_chunks, apply_sigmoid)

    n_elems = rows * LANES
    bytes_accessed = (int(yp2.size) * yp2.dtype.itemsize
                      + int(yt2.size) * yt2.dtype.itemsize
                      + num_splits * 3 * 8 * LANES * 4)
    cost = pl.CostEstimate(
        flops=5 * n_elems,
        transcendentals=n_elems if apply_sigmoid else 0,
        bytes_accessed=int(bytes_accessed),
    )

    partials = pl.pallas_call(
        kernel,
        out_shape=jax.ShapeDtypeStruct((num_splits, 3, 8, LANES), jnp.float32),
        grid_spec=pltpu.PrefetchScalarGridSpec(
            num_scalar_prefetch=0,
            grid=(num_splits, blocks_per_core),
            in_specs=[in_spec, in_spec],
            out_specs=out_spec,
        ),
        compiler_params=pltpu.CompilerParams(
            dimension_semantics=("parallel", "arbitrary"),
            vmem_limit_bytes=VMEM_LIMIT_BYTES,
        ),
        cost_estimate=cost,
    )(yp2, yt2)

    s_ht = jnp.sum(partials[:, 0])
    s_h = jnp.sum(partials[:, 1])
    s_t = jnp.sum(partials[:, 2])
    return s_ht, s_h, s_t


def dice_loss(y_pred, y_true, from_logits=False):
    """DiceLoss forward (smooth=1e-7, eps=1e-7, reduction=None).

    Mirrors the PyTorch module: with the default from_logits=False the module
    applies sigmoid to y_pred; with from_logits=True it uses y_pred as-is.
    y_true may be any numeric dtype (bf16/int8/f32); it is up-cast in VMEM.
    """
    yp = jnp.reshape(y_pred, (-1,))
    yt = jnp.reshape(y_true, (-1,))
    if yp.dtype == jnp.bool_:
        yp = yp.astype(jnp.int8)
    if yt.dtype == jnp.bool_:
        yt = yt.astype(jnp.int8)

    n = yp.shape[0]
    rows = n // LANES
    tail = n - rows * LANES
    apply_sigmoid = not from_logits
    # p = a*h + b with h = tanh(x/2) (sigmoid) or h = x (identity).
    a, b = (0.5, 0.5) if apply_sigmoid else (1.0, 0.0)

    intersection = jnp.float32(0.0)
    card = jnp.float32(0.0)

    if rows > 0:
        n_main = rows * LANES
        if tail:
            # TODO(synk): this prefix slice may materialize one copy per input
            # on the ragged path; the n % 128 == 0 path is fully zero-copy.
            yp_main = yp[:n_main]
            yt_main = yt[:n_main]
        else:
            yp_main, yt_main = yp, yt
        yp2 = yp_main.reshape(rows, LANES)
        yt2 = yt_main.reshape(rows, LANES)

        s_ht, s_h, s_t = _dice_partial_sums(yp2, yt2, apply_sigmoid)
        intersection = intersection + a * s_ht + b * s_t
        card = card + (a * s_h + b * jnp.float32(n_main)) + s_t

    if tail:
        # Tiny (<128 element) ragged tail handled in plain JAX.
        xp_t = yp[rows * LANES:].astype(jnp.float32)
        yt_t = yt[rows * LANES:].astype(jnp.float32)
        p_t = jax.nn.sigmoid(xp_t) if apply_sigmoid else xp_t
        intersection = intersection + jnp.sum(p_t * yt_t)
        card = card + jnp.sum(p_t + yt_t)

    # Exactly mirrors the PyTorch module: cardinalities = sum + smooth, then
    # (cardinalities + smooth).clamp_min(eps) in the denominator.
    cardinalities = card + jnp.float32(SMOOTH)
    denom = jnp.maximum(cardinalities + jnp.float32(SMOOTH), jnp.float32(EPS))
    dice = (2.0 * intersection + jnp.float32(SMOOTH)) / denom
    return 1.0 - dice   # reduction=None -> 0-d scalar loss


def dice_loss_ref(y_pred, y_true, from_logits=False):
    """Pure-JAX reference matching the PyTorch module."""
    yp = jnp.reshape(y_pred, (-1,)).astype(jnp.float32)
    yt = jnp.reshape(y_true, (-1,)).astype(jnp.float32)
    if not from_logits:
        yp = jax.nn.sigmoid(yp)
    intersection = jnp.sum(yp * yt)
    cardinalities = jnp.sum(yp + yt) + SMOOTH
    dice = (2.0 * intersection + SMOOTH) / jnp.maximum(cardinalities + SMOOTH, EPS)
    return 1.0 - dice


def _check(y_pred, y_true):
    out = dice_loss(y_pred, y_true)
    jax.block_until_ready(out)
    ref = dice_loss_ref(y_pred, y_true)
    assert jnp.allclose(out, ref, atol=1e-4, rtol=1e-4), (out, ref)
    return out


if __name__ == "__main__":
    key = jax.random.PRNGKey(0)
    k1, k2, k3, k4, k5, k6 = jax.random.split(key, 6)

    # 1) Small NCHW logits + binary mask (main example, n % 128 == 0).
    y_pred = jax.random.normal(k1, (2, 4, 16, 16), dtype=jnp.float32)
    y_true = (jax.random.uniform(k2, (2, 4, 16, 16)) > 0.5).astype(jnp.float32)
    _check(y_pred, y_true)

    # 2) Ragged size (n % 128 != 0) -> wrapper tail path + in-kernel row mask.
    y_pred2 = jax.random.normal(k3, (2, 3, 17, 19), dtype=jnp.float32)
    y_true2 = (jax.random.uniform(k4, (2, 3, 17, 19)) > 0.5).astype(jnp.float32)
    _check(y_pred2, y_true2)

    # 3) Multi-block path + narrow-dtype (bf16) mask stream.
    y_pred3 = jax.random.normal(k5, (1, 4, 1024, 1024), dtype=jnp.float32)
    y_true3 = (jax.random.uniform(k6, (1, 4, 1024, 1024)) > 0.5).astype(jnp.bfloat16)
    _check(y_pred3, y_true3)

    print("KERNEL_OK")
</pallas_src>

<mosaic_0001>
module attributes {stable_mosaic.version = 11 : i64} {
  func.func @kernel(%arg0: i32, %arg1: i32, %arg2: memref<16x128xf32, #tpu.memory_space<vmem>>, %arg3: memref<16x128xf32, #tpu.memory_space<vmem>>, %arg4: memref<1x3x8x128xf32, #tpu.memory_space<vmem>>) attributes {dimension_semantics = [#tpu.dimension_semantics<parallel>, #tpu.dimension_semantics<arbitrary>], iteration_bounds = array<i64: 1, 1>, scalar_prefetch = 0 : i64, scratch_operands = 0 : i64, tpu.core_type = #tpu.core_type<tc>, window_params = [{transform_indices = @transform_0, window_bounds = array<i64: 16, 128>}, {transform_indices = @transform_1, window_bounds = array<i64: 16, 128>}, {transform_indices = @transform_2, window_bounds = array<i64: 1, 3, 8, 128>}]} {
    %c0_i32 = arith.constant 0 : i32
    %0 = arith.cmpi eq, %arg1, %c0_i32 : i32
    %1 = arith.extui %0 : i1 to i32
    %c0_i32_0 = arith.constant 0 : i32
    %2 = arith.cmpi ne, %1, %c0_i32_0 : i32
    scf.if %2 {
      %cst = arith.constant 0.000000e+00 : f32
      %15 = vector.broadcast %cst : f32 to vector<1x3x8x128xf32>
      %c0 = arith.constant 0 : index
      %c0_7 = arith.constant 0 : index
      %c0_8 = arith.constant 0 : index
      %c0_9 = arith.constant 0 : index
      %16 = vector.load %arg4[%c0, %c0_7, %c0_8, %c0_9] : memref<1x3x8x128xf32, #tpu.memory_space<vmem>>, vector<1x3x8x128xf32>
      tpu.vector_store %arg4[%c0, %c0_7, %c0_8, %c0_9], %15 {strides = array<i32>} : memref<1x3x8x128xf32, #tpu.memory_space<vmem>>, vector<1x3x8x128xf32>,
    } else {
    }
    %c1_i32 = arith.constant 1 : i32
    %3 = arith.muli %arg0, %c1_i32 : i32
    %4 = arith.addi %3, %arg1 : i32
    %c16_i32 = arith.constant 16 : i32
    %5 = arith.muli %4, %c16_i32 : i32
    %c16_i32_1 = arith.constant 16 : i32
    %6 = arith.addi %5, %c16_i32_1 : i32
    %c16_i32_2 = arith.constant 16 : i32
    %7 = arith.cmpi sle, %6, %c16_i32_2 : i32
    %8 = arith.extui %7 : i1 to i32
    %c0_i32_3 = arith.constant 0 : i32
    %9 = arith.cmpi ne, %8, %c0_i32_3 : i32
    scf.if %9 {
      %c0 = arith.constant 0 : index
      %c0_7 = arith.constant 0 : index
      %15 = vector.load %arg2[%c0, %c0_7] : memref<16x128xf32, #tpu.memory_space<vmem>>, vector<16x128xf32>
      %c0_8 = arith.constant 0 : index
      %c0_9 = arith.constant 0 : index
      %16 = vector.load %arg3[%c0_8, %c0_9] : memref<16x128xf32, #tpu.memory_space<vmem>>, vector<16x128xf32>
      %cst = arith.constant 5.000000e-01 : f32
      %17 = vector.broadcast %cst : f32 to vector<16x128xf32>
      %18 = arith.mulf %17, %15 : vector<16x128xf32>
      %19 = math.tanh %18 : vector<16x128xf32>
      %c0_10 = arith.constant 0 : index
      %c0_11 = arith.constant 0 : index
      %c0_12 = arith.constant 0 : index
      %c0_13 = arith.constant 0 : index
      %20 = vector.load %arg4[%c0_10, %c0_11, %c0_12, %c0_13] : memref<1x3x8x128xf32, #tpu.memory_space<vmem>>, vector<1x1x8x128xf32>
      %21 = vector.shape_cast %20 : vector<1x1x8x128xf32> to vector<8x128xf32>
      %22 = arith.mulf %19, %16 : vector<16x128xf32>
      %23 = vector.shape_cast %22 : vector<16x128xf32> to vector<2x8x128xf32>
      %cst_14 = arith.constant dense<0.000000e+00> : vector<8x128xf32>
      %24 = vector.multi_reduction <add>, %23, %cst_14 [0] : vector<2x8x128xf32> to vector<8x128xf32>
      %25 = arith.addf %21, %24 : vector<8x128xf32>
      %c0_15 = arith.constant 0 : index
      %c0_16 = arith.constant 0 : index
      %c0_17 = arith.constant 0 : index
      %c0_18 = arith.constant 0 : index
      %26 = vector.load %arg4[%c0_15, %c0_16, %c0_17, %c0_18] : memref<1x3x8x128xf32, #tpu.memory_space<vmem>>, vector<1x1x8x128xf32>
      %27 = vector.shape_cast %26 : vector<1x1x8x128xf32> to vector<8x128xf32>
      %28 = vector.shape_cast %25 : vector<8x128xf32> to vector<1x1x8x128xf32>
      tpu.vector_store %arg4[%c0_15, %c0_16, %c0_17, %c0_18], %28 {strides = array<i32>} : memref<1x3x8x128xf32, #tpu.memory_space<vmem>>, vector<1x1x8x128xf32>,
      %c0_19 = arith.constant 0 : index
      %c1 = arith.constant 1 : index
      %c0_20 = arith.constant 0 : index
      %c0_21 = arith.constant 0 : index
      %29 = vector.load %arg4[%c0_19, %c1, %c0_20, %c0_21] : memref<1x3x8x128xf32, #tpu.memory_space<vmem>>, vector<1x1x8x128xf32>
      %30 = vector.shape_cast %29 : vector<1x1x8x128xf32> to vector<8x128xf32>
      %31 = vector.shape_cast %19 : vector<16x128xf32> to vector<2x8x128xf32>
      %cst_22 = arith.constant dense<0.000000e+00> : vector<8x128xf32>
      %32 = vector.multi_reduction <add>, %31, %cst_22 [0] : vector<2x8x128xf32> to vector<8x128xf32>
      %33 = arith.addf %30, %32 : vector<8x128xf32>
      %c0_23 = arith.constant 0 : index
      %c1_24 = arith.constant 1 : index
      %c0_25 = arith.constant 0 : index
      %c0_26 = arith.constant 0 : index
      %34 = vector.load %arg4[%c0_23, %c1_24, %c0_25, %c0_26] : memref<1x3x8x128xf32, #tpu.memory_space<vmem>>, vector<1x1x8x128xf32>
      %35 = vector.shape_cast %34 : vector<1x1x8x128xf32> to vector<8x128xf32>
      %36 = vector.shape_cast %33 : vector<8x128xf32> to vector<1x1x8x128xf32>
      tpu.vector_store %arg4[%c0_23, %c1_24, %c0_25, %c0_26], %36 {strides = array<i32>} : memref<1x3x8x128xf32, #tpu.memory_space<vmem>>, vector<1x1x8x128xf32>,
      %c0_27 = arith.constant 0 : index
      %c2 = arith.constant 2 : index
      %c0_28 = arith.constant 0 : index
      %c0_29 = arith.constant 0 : index
      %37 = vector.load %arg4[%c0_27, %c2, %c0_28, %c0_29] : memref<1x3x8x128xf32, #tpu.memory_space<vmem>>, vector<1x1x8x128xf32>
      %38 = vector.shape_cast %37 : vector<1x1x8x128xf32> to vector<8x128xf32>
      %39 = vector.shape_cast %16 : vector<16x128xf32> to vector<2x8x128xf32>
      %cst_30 = arith.constant dense<0.000000e+00> : vector<8x128xf32>
      %40 = vector.multi_reduction <add>, %39, %cst_30 [0] : vector<2x8x128xf32> to vector<8x128xf32>
      %41 = arith.addf %38, %40 : vector<8x128xf32>
      %c0_31 = arith.constant 0 : index
      %c2_32 = arith.constant 2 : index
      %c0_33 = arith.constant 0 : index
      %c0_34 = arith.constant 0 : index
      %42 = vector.load %arg4[%c0_31, %c2_32, %c0_33, %c0_34] : memref<1x3x8x128xf32, #tpu.memory_space<vmem>>, vector<1x1x8x128xf32>
      %43 = vector.shape_cast %42 : vector<1x1x8x128xf32> to vector<8x128xf32>
      %44 = vector.shape_cast %41 : vector<8x128xf32> to vector<1x1x8x128xf32>
      tpu.vector_store %arg4[%c0_31, %c2_32, %c0_33, %c0_34], %44 {strides = array<i32>} : memref<1x3x8x128xf32, #tpu.memory_space<vmem>>, vector<1x1x8x128xf32>,
    } else {
    }
    %c16_i32_4 = arith.constant 16 : i32
    %10 = arith.cmpi slt, %5, %c16_i32_4 : i32
    %c16_i32_5 = arith.constant 16 : i32
    %11 = arith.cmpi sgt, %6, %c16_i32_5 : i32
    %12 = arith.andi %10, %11 : i1
    %13 = arith.extui %12 : i1 to i32
    %c0_i32_6 = arith.constant 0 : i32
    %14 = arith.cmpi ne, %13, %c0_i32_6 : i32
    scf.if %14 {
      %c0 = arith.constant 0 : index
      %c0_7 = arith.constant 0 : index
      %15 = vector.load %arg2[%c0, %c0_7] : memref<16x128xf32, #tpu.memory_space<vmem>>, vector<16x128xf32>
      %c0_8 = arith.constant 0 : index
      %c0_9 = arith.constant 0 : index
      %16 = vector.load %arg3[%c0_8, %c0_9] : memref<16x128xf32, #tpu.memory_space<vmem>>, vector<16x128xf32>
      %cst = arith.constant 5.000000e-01 : f32
      %17 = vector.broadcast %cst : f32 to vector<16x128xf32>
      %18 = arith.mulf %17, %15 : vector<16x128xf32>
      %19 = math.tanh %18 : vector<16x128xf32>
      %20 = tpu.iota {dimensions = array<i32: 0>} : vector<16x128xi32>
      %c0_i32_10 = arith.constant 0 : i32
      %21 = arith.addi %5, %c0_i32_10 : i32
      %22 = vector.broadcast %21 : i32 to vector<16x128xi32>
      %23 = arith.addi %22, %20 : vector<16x128xi32>
      %c16_i32_11 = arith.constant 16 : i32
      %24 = vector.broadcast %c16_i32_11 : i32 to vector<16x128xi32>
      %25 = arith.cmpi slt, %23, %24 : vector<16x128xi32>
      %cst_12 = arith.constant 0.000000e+00 : f32
      %26 = vector.broadcast %cst_12 : f32 to vector<16x128xf32>
      %27 = arith.select %25, %19, %26 : vector<16x128xi1>, vector<16x128xf32>
      %cst_13 = arith.constant 0.000000e+00 : f32
      %28 = vector.broadcast %cst_13 : f32 to vector<16x128xf32>
      %29 = arith.select %25, %16, %28 : vector<16x128xi1>, vector<16x128xf32>
      %c0_14 = arith.constant 0 : index
      %c0_15 = arith.constant 0 : index
      %c0_16 = arith.constant 0 : index
      %c0_17 = arith.constant 0 : index
      %30 = vector.load %arg4[%c0_14, %c0_15, %c0_16, %c0_17] : memref<1x3x8x128xf32, #tpu.memory_space<vmem>>, vector<1x1x8x128xf32>
      %31 = vector.shape_cast %30 : vector<1x1x8x128xf32> to vector<8x128xf32>
      %32 = arith.mulf %27, %29 : vector<16x128xf32>
      %33 = vector.shape_cast %32 : vector<16x128xf32> to vector<2x8x128xf32>
      %cst_18 = arith.constant dense<0.000000e+00> : vector<8x128xf32>
      %34 = vector.multi_reduction <add>, %33, %cst_18 [0] : vector<2x8x128xf32> to vector<8x128xf32>
      %35 = arith.addf %31, %34 : vector<8x128xf32>
      %c0_19 = arith.constant 0 : index
      %c0_20 = arith.constant 0 : index
      %c0_21 = arith.constant 0 : index
      %c0_22 = arith.constant 0 : index
      %36 = vector.load %arg4[%c0_19, %c0_20, %c0_21, %c0_22] : memref<1x3x8x128xf32, #tpu.memory_space<vmem>>, vector<1x1x8x128xf32>
      %37 = vector.shape_cast %36 : vector<1x1x8x128xf32> to vector<8x128xf32>
      %38 = vector.shape_cast %35 : vector<8x128xf32> to vector<1x1x8x128xf32>
      tpu.vector_store %arg4[%c0_19, %c0_20, %c0_21, %c0_22], %38 {strides = array<i32>} : memref<1x3x8x128xf32, #tpu.memory_space<vmem>>, vector<1x1x8x128xf32>,
      %c0_23 = arith.constant 0 : index
      %c1 = arith.constant 1 : index
      %c0_24 = arith.constant 0 : index
      %c0_25 = arith.constant 0 : index
      %39 = vector.load %arg4[%c0_23, %c1, %c0_24, %c0_25] : memref<1x3x8x128xf32, #tpu.memory_space<vmem>>, vector<1x1x8x128xf32>
      %40 = vector.shape_cast %39 : vector<1x1x8x128xf32> to vector<8x128xf32>
      %41 = vector.shape_cast %27 : vector<16x128xf32> to vector<2x8x128xf32>
      %cst_26 = arith.constant dense<0.000000e+00> : vector<8x128xf32>
      %42 = vector.multi_reduction <add>, %41, %cst_26 [0] : vector<2x8x128xf32> to vector<8x128xf32>
      %43 = arith.addf %40, %42 : vector<8x128xf32>
      %c0_27 = arith.constant 0 : index
      %c1_28 = arith.constant 1 : index
      %c0_29 = arith.constant 0 : index
      %c0_30 = arith.constant 0 : index
      %44 = vector.load %arg4[%c0_27, %c1_28, %c0_29, %c0_30] : memref<1x3x8x128xf32, #tpu.memory_space<vmem>>, vector<1x1x8x128xf32>
      %45 = vector.shape_cast %44 : vector<1x1x8x128xf32> to vector<8x128xf32>
      %46 = vector.shape_cast %43 : vector<8x128xf32> to vector<1x1x8x128xf32>
      tpu.vector_store %arg4[%c0_27, %c1_28, %c0_29, %c0_30], %46 {strides = array<i32>} : memref<1x3x8x128xf32, #tpu.memory_space<vmem>>, vector<1x1x8x128xf32>,
      %c0_31 = arith.constant 0 : index
      %c2 = arith.constant 2 : index
      %c0_32 = arith.constant 0 : index
      %c0_33 = arith.constant 0 : index
      %47 = vector.load %arg4[%c0_31, %c2, %c0_32, %c0_33] : memref<1x3x8x128xf32, #tpu.memory_space<vmem>>, vector<1x1x8x128xf32>
      %48 = vector.shape_cast %47 : vector<1x1x8x128xf32> to vector<8x128xf32>
      %49 = vector.shape_cast %29 : vector<16x128xf32> to vector<2x8x128xf32>
      %cst_34 = arith.constant dense<0.000000e+00> : vector<8x128xf32>
      %50 = vector.multi_reduction <add>, %49, %cst_34 [0] : vector<2x8x128xf32> to vector<8x128xf32>
      %51 = arith.addf %48, %50 : vector<8x128xf32>
      %c0_35 = arith.constant 0 : index
      %c2_36 = arith.constant 2 : index
      %c0_37 = arith.constant 0 : index
      %c0_38 = arith.constant 0 : index
      %52 = vector.load %arg4[%c0_35, %c2_36, %c0_37, %c0_38] : memref<1x3x8x128xf32, #tpu.memory_space<vmem>>, vector<1x1x8x128xf32>
      %53 = vector.shape_cast %52 : vector<1x1x8x128xf32> to vector<8x128xf32>
      %54 = vector.shape_cast %51 : vector<8x128xf32> to vector<1x1x8x128xf32>
      tpu.vector_store %arg4[%c0_35, %c2_36, %c0_37, %c0_38], %54 {strides = array<i32>} : memref<1x3x8x128xf32, #tpu.memory_space<vmem>>, vector<1x1x8x128xf32>,
    } else {
    }
    return
  }
  func.func @transform_0(%arg0: i32, %arg1: i32) -> (i32, i32) {
    %c1_i32 = arith.constant 1 : i32
    %0 = arith.muli %arg0, %c1_i32 : i32
    %1 = arith.addi %0, %arg1 : i32
    %c0_i32 = arith.constant 0 : i32
    %2 = arith.minsi %1, %c0_i32 : i32
    %c0_i32_0 = arith.constant 0 : i32
    %c0_i32_1 = arith.constant 0 : i32
    return %2, %c0_i32_0 : i32, i32
  }
  func.func @transform_1(%arg0: i32, %arg1: i32) -> (i32, i32) {
    %c1_i32 = arith.constant 1 : i32
    %0 = arith.muli %arg0, %c1_i32 : i32
    %1 = arith.addi %0, %arg1 : i32
    %c0_i32 = arith.constant 0 : i32
    %2 = arith.minsi %1, %c0_i32 : i32
    %c0_i32_0 = arith.constant 0 : i32
    %c0_i32_1 = arith.constant 0 : i32
    return %2, %c0_i32_0 : i32, i32
  }
  func.func @transform_2(%arg0: i32, %arg1: i32) -> (i32, i32, i32, i32) {
    %c0_i32 = arith.constant 0 : i32
    %c0_i32_0 = arith.constant 0 : i32
    %c0_i32_1 = arith.constant 0 : i32
    %c0_i32_2 = arith.constant 0 : i32
    return %arg0, %c0_i32, %c0_i32_0, %c0_i32_1 : i32, i32, i32, i32
  }
}

</mosaic_0001>

<bundles_post_ra>
// kernel: tpu_custom_call.1
= control target key start
LH: loop header
LB: loop body
LE: loop exit
PB: predicated region body
PF: predicated region fallthrough
CT: control target
= control target key end

     0   :  { %7 = vsyncpa [#allocation3], 0  ;;  %s276_s0 = inlined_call_operand.hbm [shape: f32[16,128], index: 0, kind: input, shape index: {}]   ;;  %s277_s1 = inlined_call_operand.hbm [shape: f32[16,128], index: 1, kind: input, shape index: {}]   ;;  %s278_s2 = inlined_call_operand.hbm [shape: f32[1,3,8,128], index: 2, kind: output, shape index: {}]  }
   0x1   :  { %8 = vsyncpa [#allocation6], 0 }
   0x2   :  { %9 = vsyncpa [#allocation4], 0  ;;  %s238_s9 = smov [#allocation2]  }
   0x3   :  { %s21_s10 = sshll.u32 %s238_s9, 4  ;;  %s22_s10 = int_to_ptr.vmem [resolvable:$true] %s21_s10 }
   0x4   :  { %s180_s11 = scalar_lea.vmem %s22_s10, 256  ;;  %p185_p1 = scmp.lt.s32.totalorder %s22_s10, %s22_s10 }
   0x5   :  { %p181_p0 = scmp.ne.s32.totalorder %s22_s10, %s180_s11  ;;  %p186_p2 = scmp.lt.s32.totalorder %s180_s11, %s180_s11 }
   0x7   :  { %p187_p3 = por %p186_p2, %p185_p1 }
   0x9   :  { %p188_p4 = pnand %p187_p3, %p181_p0 }
   0xb   :  { %191 = shalt.err (!%p188_p4)
}
   0xc   :  { %s239_s12 = smov 128   ;;  %s240_s13 = smov 8  }
   0xd   :  { %27 = dma.hbm_to_vmem [thread:$0]  %s276_s0, 256, %s22_s10, [#allocation3], %s239_s12, %s239_s12, %s240_s13  }
   0xe   :  { %s241_s16 = smov [#allocation5]  }
   0xf   :  { %s39_s17 = sshll.u32 %s241_s16, 4  ;;  %s40_s17 = int_to_ptr.vmem [resolvable:$true] %s39_s17 }
  0x10   :  { %s200_s18 = scalar_lea.vmem %s40_s17, 256  ;;  %p205_p6 = scmp.lt.s32.totalorder %s40_s17, %s40_s17 }
  0x11   :  { %p201_p5 = scmp.ne.s32.totalorder %s40_s17, %s200_s18  ;;  %p206_p7 = scmp.lt.s32.totalorder %s200_s18, %s200_s18 }
  0x13   :  { %p207_p8 = por %p206_p7, %p205_p6 }
  0x15   :  { %p208_p9 = pnand %p207_p8, %p201_p5 }
  0x17   :  { %211 = shalt.err (!%p208_p9)
}
  0x18   :  { %45 = dma.hbm_to_vmem [thread:$0]  %s277_s1, 256, %s40_s17, [#allocation6], %s239_s12, %s239_s12, %s240_s13  }
  0x19   :  { %232 = dma.done.wait [#allocation3], 256  }
  0x1a   :  { %233 = vsyncadd [#allocation3], 4294967040 }
  0x1b   :  { %234 = dma.done.wait [#allocation6], 256  }
  0x1c   :  { %235 = vsyncadd [#allocation6], 4294967040  ;;  %v74_v0 = vld [vmem:[#allocation2] sm:$0xff]  ;;  %v75_v1 = vld [vmem:[#allocation2 + $0x8] sm:$0xff]  ;;  %s242_s0 = smov [#allocation7]  }
  0x1d   :  { %v76_v2 = vld [vmem:[#allocation5] sm:$0xff]  ;;  %v77_v3 = vld [vmem:[#allocation5 + $0x8] sm:$0xff]  ;;  %v78_v4 = vmul.f32 0.5, %v74_v0  ;;  %v79_v5 = vmul.f32 0.5, %v75_v1  ;;  %s145_s1 = sshll.u32 %s242_s0, 4  ;;  %s146_s1 = int_to_ptr.vmem [resolvable:$true] %s145_s1 }
  0x1e   :  { %v95_v6 = vadd.f32 %v77_v3, %v76_v2  ;;  %s212_s21 = scalar_lea.vmem %s146_s1, 384  ;;  %p217_p11 = scmp.lt.s32.totalorder %s146_s1, %s146_s1 }
  0x1f   :  { %168 = vtanh.f32 %v78_v4  ;;  %p213_p10 = scmp.ne.s32.totalorder %s146_s1, %s212_s21  ;;  %p218_p12 = scmp.lt.s32.totalorder %s212_s21, %s212_s21 }
  0x20   :  { %170 = vtanh.f32 %v79_v5  ;;  %97 = vst [vmem:[#allocation7 + $0x10] sm:$0xff] %v95_v6 }
  0x21   :  { %p219_p13 = por %p218_p12, %p217_p11 }
  0x23   :  { %p220_p0 = pnand %p219_p13, %p213_p10 }
  0x2c   :  { %v169_v7 = vpop.eup %168 }
  0x2d   :  { %v171_v8 = vpop.eup %170  ;;  %v83_v9 = vmul.f32 %v169_v7, %v76_v2 }
  0x2e   :  { %v84_v10 = vmul.f32 %v171_v8, %v77_v3  ;;  %v90_v11 = vadd.f32 %v171_v8, %v169_v7 }
  0x30   :  { %v85_v12 = vadd.f32 %v84_v10, %v83_v9  ;;  %92 = vst [vmem:[#allocation7 + $0x8] sm:$0xff] %v90_v11 }
  0x32   :  { %87 = vst [vmem:[#allocation7] sm:$0xff] %v85_v12 }
  0x33   :  { %223 = shalt.err (!%p220_p0)
}
  0x34   :  { %151 = dma.vmem_to_hbm [thread:$0]  %s146_s1, 384, %s278_s2, [#allocation4], %s239_s12, %s239_s12, %s240_s13  }
  0x35   :  { %236 = dma.done.wait [#allocation4], 384  }
  0x36   :  { %237 = vsyncadd [#allocation4], 4294966912 }
  0x37   :  { %155 = vsyncpa [#allocation3], 1 }
  0x38   :  { %156 = vsyncpa [#allocation6], 1 }
  0x39   :  { %157 = vsyncpa [#allocation4], 1 }

</bundles_post_ra>
